<compile_context>
chip_gen: v6e
topology: v6e:2x2x1
jax: 0.10.0
libtpu: 0.0.40
codegen_flags: <defaults>
</compile_context>

<pallas_src>
import numpy as np
import jax
import jax.numpy as jnp
from jax.experimental import pallas as pl
from jax.experimental.pallas import tpu as pltpu

LOSS_WEIGHTS = {"L1": 1.0, "L2": 0.5, "CharbonnierLoss": 0.25, "FFTLoss": 0.1}
CHARBONNIER_EPS = 1e-6


def _make_criterion_kernel(C, H, W, eps):
    def kernel(pred_ref, targ_ref, cw_ref, sw_ref, chb_ref, shb_ref, out_ref):
        # Per-batch block: (C*H, W) slab (all channels / rows batched together).
        d = pred_ref[...].astype(jnp.float32) - targ_ref[...].astype(jnp.float32)
        dsq = d * d

        l1 = jnp.sum(jnp.abs(d))
        l2 = jnp.sum(dsq)

        # Charbonnier: per-pixel mean over channels (split of the untiled leading dim).
        sq_c = jnp.sum(jnp.reshape(dsq, (C, H, W)), axis=0)        # (H, W)
        char = jnp.sum(jnp.sqrt(sq_c * (1.0 / C) + eps))

        # rfft2(pred) - rfft2(target) == rfft2(diff) by linearity.
        # W-stage DFT: one big matmul over all C*H rows, output padded to 128 lanes.
        cw = cw_ref[...]                                           # (W, WF_PAD)
        sw = sw_ref[...]
        re1 = jnp.dot(d, cw, preferred_element_type=jnp.float32)   # (C*H, WF_PAD)
        im1 = -jnp.dot(d, sw, preferred_element_type=jnp.float32)

        # H-stage DFT: block-diagonal kron(I_C, DFT_H) applied on the left.
        # Single (C*H, C*H) @ (C*H, WF_PAD) matmuls -- no transposes / tiny matmuls.
        chb = chb_ref[...]                                         # (C*H, C*H)
        shb = shb_ref[...]
        rr = (jnp.dot(chb, re1, preferred_element_type=jnp.float32)
              + jnp.dot(shb, im1, preferred_element_type=jnp.float32))
        ii = (jnp.dot(chb, im1, preferred_element_type=jnp.float32)
              - jnp.dot(shb, re1, preferred_element_type=jnp.float32))
        fft = jnp.sum(jnp.abs(rr)) + jnp.sum(jnp.abs(ii))

        # Lane-dense (8, 128) output tile: partial sums in sublanes 0..3, full vst.
        sub = jax.lax.broadcasted_iota(jnp.int32, (8, 128), 0)
        tile = (jnp.where(sub == 0, l1, 0.0)
                + jnp.where(sub == 1, l2, 0.0)
                + jnp.where(sub == 2, char, 0.0)
                + jnp.where(sub == 3, fft, 0.0))
        out_ref[...] = tile.astype(jnp.float32)

    return kernel


def criterion_pallas(pred, targ, weights=LOSS_WEIGHTS, eps=CHARBONNIER_EPS):
    B, C, H, W = pred.shape
    Wf = W // 2 + 1
    WF_PAD = max(128, ((Wf + 127) // 128) * 128)   # pad rfft width to lane multiple

    # --- host-side constant DFT basis matrices (layout plumbing only) -------------
    w_idx = np.arange(W)[:, None]
    k_idx = np.arange(Wf)[None, :]
    ang_w = 2.0 * np.pi * (w_idx * k_idx) / W
    cw = np.zeros((W, WF_PAD), np.float32)
    sw = np.zeros((W, WF_PAD), np.float32)
    cw[:, :Wf] = np.cos(ang_w)
    sw[:, :Wf] = np.sin(ang_w)

    h_idx = np.arange(H)
    ang_h = 2.0 * np.pi * np.outer(h_idx, h_idx) / H
    ch_m = np.cos(ang_h).astype(np.float32)
    sh_m = np.sin(ang_h).astype(np.float32)
    eye_c = np.eye(C, dtype=np.float32)
    chb = np.kron(eye_c, ch_m)                      # (C*H, C*H), block diagonal
    shb = np.kron(eye_c, sh_m)

    # Free views: merge (C, H) so each grid block is a single 2-D slab.
    pred3 = pred.reshape(B, C * H, W)
    targ3 = targ.reshape(B, C * H, W)

    kernel = _make_criterion_kernel(C, H, W, eps)
    parts = pl.pallas_call(
        kernel,
        out_shape=jax.ShapeDtypeStruct((B, 8, 128), jnp.float32),
        grid=(B,),
        in_specs=[
            pl.BlockSpec((None, C * H, W), lambda b: (b, 0, 0)),
            pl.BlockSpec((None, C * H, W), lambda b: (b, 0, 0)),
            pl.BlockSpec((W, WF_PAD), lambda b: (0, 0)),
            pl.BlockSpec((W, WF_PAD), lambda b: (0, 0)),
            pl.BlockSpec((C * H, C * H), lambda b: (0, 0)),
            pl.BlockSpec((C * H, C * H), lambda b: (0, 0)),
        ],
        out_specs=pl.BlockSpec((None, 8, 128), lambda b: (b, 0, 0)),
        compiler_params=pltpu.CompilerParams(
            dimension_semantics=("parallel",),
            vmem_limit_bytes=32 * 1024 * 1024,
        ),
    )(pred3, targ3, jnp.asarray(cw), jnp.asarray(sw), jnp.asarray(chb), jnp.asarray(shb))

    # Final weighted combine of the per-batch partial sums (a handful of scalars).
    sums = jnp.sum(parts[:, :4, 0], axis=0)
    n_el = float(B * C * H * W)
    n_fft = float(B * C * H * Wf * 2)
    total = (weights.get("L1", 0.0) * sums[0] / n_el
             + weights.get("L2", 0.0) * sums[1] / n_el
             + weights.get("CharbonnierLoss", 0.0) * sums[2] / float(B * H * W)
             + weights.get("FFTLoss", 0.0) * sums[3] / n_fft)
    return total


def criterion_ref(pred, targ, weights=LOSS_WEIGHTS, eps=CHARBONNIER_EPS):
    """Pure-JAX reference matching the PyTorch Criterion semantics."""
    d = pred - targ
    total = weights["L1"] * jnp.mean(jnp.abs(d))
    total += weights["L2"] * jnp.mean(d * d)
    diff_sq_color = jnp.mean(d * d, axis=1, keepdims=True)
    total += weights["CharbonnierLoss"] * jnp.mean(jnp.sqrt(diff_sq_color + eps))
    pf = jnp.fft.rfft2(pred.astype(jnp.float32))
    tf = jnp.fft.rfft2(targ.astype(jnp.float32))
    pf_s = jnp.stack([pf.real, pf.imag], axis=-1)
    tf_s = jnp.stack([tf.real, tf.imag], axis=-1)
    total += weights["FFTLoss"] * jnp.mean(jnp.abs(pf_s - tf_s))
    return total


if __name__ == "__main__":
    key = jax.random.PRNGKey(0)
    k1, k2 = jax.random.split(key)
    B, C, H, W = 2, 4, 16, 16
    pred = jax.random.uniform(k1, (B, C, H, W), dtype=jnp.float32)
    targ = jax.random.uniform(k2, (B, C, H, W), dtype=jnp.float32)

    loss = criterion_pallas(pred, targ)
    loss = jax.block_until_ready(loss)

    ref = jax.block_until_ready(criterion_ref(pred, targ))
    np.testing.assert_allclose(np.asarray(loss), np.asarray(ref), rtol=1e-3, atol=1e-4)

    print("KERNEL_OK")
</pallas_src>

<mosaic_0001>
module attributes {stable_mosaic.version = 11 : i64} {
  func.func @kernel(%arg0: i32, %arg1: memref<1x64x16xf32, #tpu.memory_space<vmem>>, %arg2: memref<1x64x16xf32, #tpu.memory_space<vmem>>, %arg3: memref<16x128xf32, #tpu.memory_space<vmem>>, %arg4: memref<16x128xf32, #tpu.memory_space<vmem>>, %arg5: memref<64x64xf32, #tpu.memory_space<vmem>>, %arg6: memref<64x64xf32, #tpu.memory_space<vmem>>, %arg7: memref<1x8x128xf32, #tpu.memory_space<vmem>>) attributes {dimension_semantics = [#tpu.dimension_semantics<parallel>], iteration_bounds = array<i64: 2>, scalar_prefetch = 0 : i64, scratch_operands = 0 : i64, tpu.core_type = #tpu.core_type<tc>, window_params = [{transform_indices = @transform_0, window_bounds = array<i64: 1, 64, 16>}, {transform_indices = @transform_1, window_bounds = array<i64: 1, 64, 16>}, {pipeline_mode = #tpu.pipeline_mode<synchronous>, transform_indices = @transform_2, window_bounds = array<i64: 16, 128>}, {pipeline_mode = #tpu.pipeline_mode<synchronous>, transform_indices = @transform_3, window_bounds = array<i64: 16, 128>}, {pipeline_mode = #tpu.pipeline_mode<synchronous>, transform_indices = @transform_4, window_bounds = array<i64: 64, 64>}, {pipeline_mode = #tpu.pipeline_mode<synchronous>, transform_indices = @transform_5, window_bounds = array<i64: 64, 64>}, {transform_indices = @transform_6, window_bounds = array<i64: 1, 8, 128>}]} {
    %c0 = arith.constant 0 : index
    %c0_0 = arith.constant 0 : index
    %c0_1 = arith.constant 0 : index
    %0 = vector.load %arg1[%c0, %c0_0, %c0_1] : memref<1x64x16xf32, #tpu.memory_space<vmem>>, vector<1x64x16xf32>
    %1 = vector.shape_cast %0 : vector<1x64x16xf32> to vector<64x16xf32>
    %c0_2 = arith.constant 0 : index
    %c0_3 = arith.constant 0 : index
    %c0_4 = arith.constant 0 : index
    %2 = vector.load %arg2[%c0_2, %c0_3, %c0_4] : memref<1x64x16xf32, #tpu.memory_space<vmem>>, vector<1x64x16xf32>
    %3 = vector.shape_cast %2 : vector<1x64x16xf32> to vector<64x16xf32>
    %4 = arith.subf %1, %3 : vector<64x16xf32>
    %5 = arith.mulf %4, %4 : vector<64x16xf32>
    %6 = math.absf %4 : vector<64x16xf32>
    %7 = vector.shape_cast %6 : vector<64x16xf32> to vector<1x64x16xf32>
    %cst = arith.constant dense<0.000000e+00> : vector<1xf32>
    %8 = vector.multi_reduction <add>, %7, %cst [1, 2] : vector<1x64x16xf32> to vector<1xf32>
    %9 = vector.shape_cast %8 : vector<1xf32> to vector<1x1x1xf32>
    %10 = vector.extract %9[0, 0, 0] : f32 from vector<1x1x1xf32>
    %11 = vector.shape_cast %5 : vector<64x16xf32> to vector<1x64x16xf32>
    %cst_5 = arith.constant dense<0.000000e+00> : vector<1xf32>
    %12 = vector.multi_reduction <add>, %11, %cst_5 [1, 2] : vector<1x64x16xf32> to vector<1xf32>
    %13 = vector.shape_cast %12 : vector<1xf32> to vector<1x1x1xf32>
    %14 = vector.extract %13[0, 0, 0] : f32 from vector<1x1x1xf32>
    %15 = vector.shape_cast %5 : vector<64x16xf32> to vector<4x16x16xf32>
    %cst_6 = arith.constant dense<0.000000e+00> : vector<16x16xf32>
    %16 = vector.multi_reduction <add>, %15, %cst_6 [0] : vector<4x16x16xf32> to vector<16x16xf32>
    %cst_7 = arith.constant 2.500000e-01 : f32
    %17 = vector.broadcast %cst_7 : f32 to vector<16x16xf32>
    %18 = arith.mulf %16, %17 : vector<16x16xf32>
    %cst_8 = arith.constant 9.99999997E-7 : f32
    %19 = vector.broadcast %cst_8 : f32 to vector<16x16xf32>
    %20 = arith.addf %18, %19 : vector<16x16xf32>
    %21 = math.sqrt %20 : vector<16x16xf32>
    %22 = vector.shape_cast %21 : vector<16x16xf32> to vector<1x16x16xf32>
    %cst_9 = arith.constant dense<0.000000e+00> : vector<1xf32>
    %23 = vector.multi_reduction <add>, %22, %cst_9 [1, 2] : vector<1x16x16xf32> to vector<1xf32>
    %24 = vector.shape_cast %23 : vector<1xf32> to vector<1x1x1xf32>
    %25 = vector.extract %24[0, 0, 0] : f32 from vector<1x1x1xf32>
    %c0_10 = arith.constant 0 : index
    %c0_11 = arith.constant 0 : index
    %26 = vector.load %arg3[%c0_10, %c0_11] : memref<16x128xf32, #tpu.memory_space<vmem>>, vector<16x128xf32>
    %c0_12 = arith.constant 0 : index
    %c0_13 = arith.constant 0 : index
    %27 = vector.load %arg4[%c0_12, %c0_13] : memref<16x128xf32, #tpu.memory_space<vmem>>, vector<16x128xf32>
    %cst_14 = arith.constant dense<0.000000e+00> : vector<64x128xf32>
    %28 = tpu.matmul %4, %26, %cst_14 {dimension_numbers = #tpu.dot_dimension_numbers<[1], [0], [0], [1], [0, 0, 1, 1], [], []>} : vector<64x16xf32>, vector<16x128xf32>, vector<64x128xf32> -> vector<64x128xf32>
    %cst_15 = arith.constant dense<0.000000e+00> : vector<64x128xf32>
    %29 = tpu.matmul %4, %27, %cst_15 {dimension_numbers = #tpu.dot_dimension_numbers<[1], [0], [0], [1], [0, 0, 1, 1], [], []>} : vector<64x16xf32>, vector<16x128xf32>, vector<64x128xf32> -> vector<64x128xf32>
    %cst_16 = arith.constant 0.000000e+00 : f32
    %30 = vector.broadcast %cst_16 : f32 to vector<64x128xf32>
    %31 = arith.subf %30, %29 : vector<64x128xf32>
    %c0_17 = arith.constant 0 : index
    %c0_18 = arith.constant 0 : index
    %32 = vector.load %arg5[%c0_17, %c0_18] : memref<64x64xf32, #tpu.memory_space<vmem>>, vector<64x64xf32>
    %c0_19 = arith.constant 0 : index
    %c0_20 = arith.constant 0 : index
    %33 = vector.load %arg6[%c0_19, %c0_20] : memref<64x64xf32, #tpu.memory_space<vmem>>, vector<64x64xf32>
    %cst_21 = arith.constant dense<0.000000e+00> : vector<64x128xf32>
    %34 = tpu.matmul %32, %28, %cst_21 {dimension_numbers = #tpu.dot_dimension_numbers<[1], [0], [0], [1], [0, 0, 1, 1], [], []>} : vector<64x64xf32>, vector<64x128xf32>, vector<64x128xf32> -> vector<64x128xf32>
    %cst_22 = arith.constant dense<0.000000e+00> : vector<64x128xf32>
    %35 = tpu.matmul %33, %31, %cst_22 {dimension_numbers = #tpu.dot_dimension_numbers<[1], [0], [0], [1], [0, 0, 1, 1], [], []>} : vector<64x64xf32>, vector<64x128xf32>, vector<64x128xf32> -> vector<64x128xf32>
    %36 = arith.addf %34, %35 : vector<64x128xf32>
    %cst_23 = arith.constant dense<0.000000e+00> : vector<64x128xf32>
    %37 = tpu.matmul %32, %31, %cst_23 {dimension_numbers = #tpu.dot_dimension_numbers<[1], [0], [0], [1], [0, 0, 1, 1], [], []>} : vector<64x64xf32>, vector<64x128xf32>, vector<64x128xf32> -> vector<64x128xf32>
    %cst_24 = arith.constant dense<0.000000e+00> : vector<64x128xf32>
    %38 = tpu.matmul %33, %28, %cst_24 {dimension_numbers = #tpu.dot_dimension_numbers<[1], [0], [0], [1], [0, 0, 1, 1], [], []>} : vector<64x64xf32>, vector<64x128xf32>, vector<64x128xf32> -> vector<64x128xf32>
    %39 = arith.subf %37, %38 : vector<64x128xf32>
    %40 = math.absf %36 : vector<64x128xf32>
    %41 = vector.shape_cast %40 : vector<64x128xf32> to vector<1x64x128xf32>
    %cst_25 = arith.constant dense<0.000000e+00> : vector<1xf32>
    %42 = vector.multi_reduction <add>, %41, %cst_25 [1, 2] : vector<1x64x128xf32> to vector<1xf32>
    %43 = vector.shape_cast %42 : vector<1xf32> to vector<1x1x1xf32>
    %44 = vector.extract %43[0, 0, 0] : f32 from vector<1x1x1xf32>
    %45 = math.absf %39 : vector<64x128xf32>
    %46 = vector.shape_cast %45 : vector<64x128xf32> to vector<1x64x128xf32>
    %cst_26 = arith.constant dense<0.000000e+00> : vector<1xf32>
    %47 = vector.multi_reduction <add>, %46, %cst_26 [1, 2] : vector<1x64x128xf32> to vector<1xf32>
    %48 = vector.shape_cast %47 : vector<1xf32> to vector<1x1x1xf32>
    %49 = vector.extract %48[0, 0, 0] : f32 from vector<1x1x1xf32>
    %50 = arith.addf %44, %49 : f32
    %51 = tpu.iota {dimensions = array<i32: 0>} : vector<8x128xi32>
    %c0_i32 = arith.constant 0 : i32
    %52 = vector.broadcast %c0_i32 : i32 to vector<8x128xi32>
    %53 = arith.cmpi eq, %51, %52 : vector<8x128xi32>
    %cst_27 = arith.constant 0.000000e+00 : f32
    %54 = vector.broadcast %10 : f32 to vector<8x128xf32>
    %55 = vector.broadcast %cst_27 : f32 to vector<8x128xf32>
    %56 = arith.select %53, %54, %55 : vector<8x128xi1>, vector<8x128xf32>
    %c1_i32 = arith.constant 1 : i32
    %57 = vector.broadcast %c1_i32 : i32 to vector<8x128xi32>
    %58 = arith.cmpi eq, %51, %57 : vector<8x128xi32>
    %cst_28 = arith.constant 0.000000e+00 : f32
    %59 = vector.broadcast %14 : f32 to vector<8x128xf32>
    %60 = vector.broadcast %cst_28 : f32 to vector<8x128xf32>
    %61 = arith.select %58, %59, %60 : vector<8x128xi1>, vector<8x128xf32>
    %62 = arith.addf %56, %61 : vector<8x128xf32>
    %c2_i32 = arith.constant 2 : i32
    %63 = vector.broadcast %c2_i32 : i32 to vector<8x128xi32>
    %64 = arith.cmpi eq, %51, %63 : vector<8x128xi32>
    %cst_29 = arith.constant 0.000000e+00 : f32
    %65 = vector.broadcast %25 : f32 to vector<8x128xf32>
    %66 = vector.broadcast %cst_29 : f32 to vector<8x128xf32>
    %67 = arith.select %64, %65, %66 : vector<8x128xi1>, vector<8x128xf32>
    %68 = arith.addf %62, %67 : vector<8x128xf32>
    %c3_i32 = arith.constant 3 : i32
    %69 = vector.broadcast %c3_i32 : i32 to vector<8x128xi32>
    %70 = arith.cmpi eq, %51, %69 : vector<8x128xi32>
    %cst_30 = arith.constant 0.000000e+00 : f32
    %71 = vector.broadcast %50 : f32 to vector<8x128xf32>
    %72 = vector.broadcast %cst_30 : f32 to vector<8x128xf32>
    %73 = arith.select %70, %71, %72 : vector<8x128xi1>, vector<8x128xf32>
    %74 = arith.addf %68, %73 : vector<8x128xf32>
    %c0_31 = arith.constant 0 : index
    %c0_32 = arith.constant 0 : index
    %c0_33 = arith.constant 0 : index
    %75 = vector.load %arg7[%c0_31, %c0_32, %c0_33] : memref<1x8x128xf32, #tpu.memory_space<vmem>>, vector<1x8x128xf32>
    %76 = vector.shape_cast %75 : vector<1x8x128xf32> to vector<8x128xf32>
    %77 = vector.shape_cast %74 : vector<8x128xf32> to vector<1x8x128xf32>
    tpu.vector_store %arg7[%c0_31, %c0_32, %c0_33], %77 {strides = array<i32>} : memref<1x8x128xf32, #tpu.memory_space<vmem>>, vector<1x8x128xf32>,
    return
  }
  func.func @transform_0(%arg0: i32) -> (i32, i32, i32) {
    %c0_i32 = arith.constant 0 : i32
    %c0_i32_0 = arith.constant 0 : i32
    %c0_i32_1 = arith.constant 0 : i32
    return %arg0, %c0_i32, %c0_i32_0 : i32, i32, i32
  }
  func.func @transform_1(%arg0: i32) -> (i32, i32, i32) {
    %c0_i32 = arith.constant 0 : i32
    %c0_i32_0 = arith.constant 0 : i32
    %c0_i32_1 = arith.constant 0 : i32
    return %arg0, %c0_i32, %c0_i32_0 : i32, i32, i32
  }
  func.func @transform_2(%arg0: i32) -> (i32, i32) {
    %c0_i32 = arith.constant 0 : i32
    %c0_i32_0 = arith.constant 0 : i32
    %c0_i32_1 = arith.constant 0 : i32
    return %c0_i32, %c0_i32_0 : i32, i32
  }
  func.func @transform_3(%arg0: i32) -> (i32, i32) {
    %c0_i32 = arith.constant 0 : i32
    %c0_i32_0 = arith.constant 0 : i32
    %c0_i32_1 = arith.constant 0 : i32
    return %c0_i32, %c0_i32_0 : i32, i32
  }
  func.func @transform_4(%arg0: i32) -> (i32, i32) {
    %c0_i32 = arith.constant 0 : i32
    %c0_i32_0 = arith.constant 0 : i32
    %c0_i32_1 = arith.constant 0 : i32
    return %c0_i32, %c0_i32_0 : i32, i32
  }
  func.func @transform_5(%arg0: i32) -> (i32, i32) {
    %c0_i32 = arith.constant 0 : i32
    %c0_i32_0 = arith.constant 0 : i32
    %c0_i32_1 = arith.constant 0 : i32
    return %c0_i32, %c0_i32_0 : i32, i32
  }
  func.func @transform_6(%arg0: i32) -> (i32, i32, i32) {
    %c0_i32 = arith.constant 0 : i32
    %c0_i32_0 = arith.constant 0 : i32
    %c0_i32_1 = arith.constant 0 : i32
    return %arg0, %c0_i32, %c0_i32_0 : i32, i32, i32
  }
}

</mosaic_0001>

<bundles_post_ra>
// kernel: tpu_custom_call.1
= control target key start
LH: loop header
LB: loop body
LE: loop exit
PB: predicated region body
PF: predicated region fallthrough
CT: control target
= control target key end

     0   :  { %11 = vsyncpa [#allocation3], 0  ;;  %s2096_s0 = inlined_call_operand.vmem [shape: f32[2,64,16], index: 0, kind: input, shape index: {}]   ;;  %s2097_s1 = inlined_call_operand.vmem [shape: f32[2,64,16], index: 1, kind: input, shape index: {}]   ;;  %s2098_s2 = inlined_call_operand.vmem [shape: f32[16,128], index: 2, kind: input, shape index: {}]   ;;  %s2099_s3 = inlined_call_operand.vmem [shape: f32[16,128], index: 3, kind: input, shape index: {}]   ;;  %s2100_s4 = inlined_call_operand.vmem [shape: f32[64,64], index: 4, kind: input, shape index: {}]   ;;  %s2101_s5 = inlined_call_operand.vmem [shape: f32[64,64], index: 5, kind: input, shape index: {}]   ;;  %s2102_s6 = inlined_call_operand.hbm [shape: f32[2,8,128], index: 6, kind: output, shape index: {}]  }
   0x1   :  { %13 = vsyncpa [#allocation3 + $0x1], 0  ;;  %s1728_s21 = smov 0   ;;  %s1730_s22 = smov 0  }
   0x2   :  { %s1732_s23 = smov 0   ;;  %s1734_s24 = smov 0  }
   0x3 LB: > { %s1749_s25 = sadd.s32 4294967295, %s1690_s24   ;;  %s1286_s26 = sadd.s32 4294967294, %s1690_s24   ;;  %s1690_s24 = sphi %s1734_s24, %s2108_s24   ;;  %s1686_s23 = sphi %s1732_s23, %s2107_s23   ;;  %s1682_s22 = sphi %s1730_s22, %s2106_s22   ;;  %s1678_s21 = sphi %s1728_s21, %s2105_s21  }
   0x4   : > { %s1753_s27 = sadd.s32 1, %s1690_s24   ;;  %s162_s28 = sadd.s32 1, %s1686_s23 }
   0x5   : > { %s159_s29 = ssub.s32 %s1690_s24, %s1753_s27  ;;  %p172_p0 = scmp.ne.s32.totalorder %s1686_s23, %s1682_s22 }
   0x6   : > { %p160_p1 = scmp.eq.s32.totalorder %s159_s29, 0  ;;  %p173_p2 = scmp.eq.s32.totalorder %s1749_s25, 1 }
   0x7   : > { %p178_p3 = scmp.ne.s32.totalorder %s1682_s22, %s1678_s21  ;;  %p179_p4 = scmp.eq.s32.totalorder %s1286_s26, 1 }
   0x8   : > { %s1764_s30 = scalar_select %p160_p1, %s1686_s23, %s162_s28  }
   0x9   : > { %p1766_p5 = por %p173_p2, %p172_p0  ;;  %p1770_p6 = por %p179_p4, %p178_p3 }
   0xa   : > { %p1289_p7 = scmp.ge.s32.totalorder %s1690_s24, 1  ;;  %p225_p8 = scmp.lt.s32.totalorder %s1690_s24, 3 }
   0xc   : > { %p226_p9 = pnand %p1289_p7, %p225_p8 }
   0xd   : > { %p260_p10 = scmp.lt.s32.totalorder (!%p226_p9), %s1749_s25, 1  ;;  %s257_s14 = sand.u32 (!%p226_p9), 1, %s1682_s22  }
   0xe   : > { %229 = sbr.rel (%p226_p9) target bundleno = 708 (0x2c4), region = 44  ;;  %s1290_s16 = sshll.u32 (!%p226_p9), %s257_s14, 3 }
   0xf   : > { %s1344_s20 = sshll.u32 (!%p226_p9), %s1749_s25, 7  ;;  %s1202_s11 = scalar_lea.sflag (!%p226_p9), [#allocation3], %s257_s14 }
  0x10   : > { %s1213_s10 = scalar_lea.hbm (!%p226_p9), %s2102_s6, %s1344_s20 }
  0x13   : > { %v396_v0 = vld [vmem:[%s2098_s2 + $0x8] sm:$0xff]  ;;  %v395_v2 = vld [vmem:[%s2098_s2] sm:$0xff]  ;;  %s261_s17 = scalar_select %p260_p10, %s1749_s25, 1  ;;  %vm310_vm0 = vcmask 130048   ;;  %vm657_vm1 = vcmask 523264   ;;  %v643_v56 = vld [vmem:[%s2100_s4 + $0x10] sm:$0xff] }
  0x14   : > { %v398_v1 = vld [vmem:[%s2099_s3 + $0x8] sm:$0xff]  ;;  %1433 = vmatprep.subr.mxu0 %v396_v0  ;;  %v397_v3 = vld [vmem:[%s2099_s3] sm:$0xff]  ;;  %v651_v57 = vld [vmem:[%s2101_s5 + $0x10] sm:$0xff] }
  0x15   : > { %1449 = vmatprep.subr.mxu1 %v398_v1  ;;  %1434 = vmatpush3.msra.mxu0 %v396_v0  ;;  %s1347_s18 = sshll.u32 %s261_s17, 6  ;;  %v1867_v28 = vld [vmem:[%s2100_s4] sm:$0xff]  ;;  %v1917_v54 = vld [vmem:[%s2100_s4 + $0x8] sm:$0xff]  ;;  %v644_v58 = vld [vmem:[%s2100_s4 + $0x18] sm:$0xff] }
  0x16   : > { %1450 = vmatpush3.msra.mxu1 %v398_v1  ;;  %1435 = vmatprep.subr.mxu0 %v395_v2  ;;  %s1793_s26 = scalar_lea.vmem %s2096_s0, %s1347_s18  ;;  %s1798_s9 = scalar_lea.vmem %s2097_s1, %s1347_s18  ;;  %v1874_v29 = vld [vmem:[%s2101_s5] sm:$0xff]  ;;  %v1924_v55 = vld [vmem:[%s2101_s5 + $0x8] sm:$0xff]  ;;  %v652_v59 = vld [vmem:[%s2101_s5 + $0x18] sm:$0xff] }
  0x17   : > { %1451 = vmatprep.subr.mxu1 %v397_v3  ;;  %1436 = vmatpush3.msra.mxu0 %v395_v2  ;;  %v270_v4 = vld [vmem:[%s1793_s26] sm:$0xff]  ;;  %v271_v6 = vld [vmem:[%s1793_s26 + $0x8] sm:$0xff]  ;;  %v272_v9 = vld [vmem:[%s1793_s26 + $0x10] sm:$0xff] }
  0x18   : > { %1452 = vmatpush3.msra.mxu1 %v397_v3  ;;  %v278_v5 = vld [vmem:[%s1798_s9] sm:$0xff]  ;;  %v279_v8 = vld [vmem:[%s1798_s9 + $0x8] sm:$0xff]  ;;  %v280_v10 = vld [vmem:[%s1798_s9 + $0x10] sm:$0xff] }
  0x19   : > { %v1803_v7 = vsub.f32 %v270_v4, %v278_v5  ;;  %v1808_v11 = vsub.f32 %v271_v6, %v279_v8  ;;  %v1810_v12 = vsub.f32 %v272_v9, %v280_v10  ;;  %v273_v13 = vld [vmem:[%s1793_s26 + $0x18] sm:$0xff]  ;;  %v274_v15 = vld [vmem:[%s1793_s26 + $0x20] sm:$0xff]  ;;  %v275_v19 = vld [vmem:[%s1793_s26 + $0x28] sm:$0xff] }
  0x1a   : > { %v281_v14 = vld [vmem:[%s1798_s9 + $0x18] sm:$0xff]  ;;  %v282_v16 = vld [vmem:[%s1798_s9 + $0x20] sm:$0xff]  ;;  %v283_v20 = vld [vmem:[%s1798_s9 + $0x28] sm:$0xff] }
  0x1b   : > { %1437 = vmatprep.mubr.msk.f32.mxu0 %vm310_vm0, %v1803_v7  ;;  %1453 = vmatprep.mubr.msk.f32.mxu1 %vm310_vm0, %v1803_v7  ;;  %v1824_v17 = vsub.f32 %v273_v13, %v281_v14  ;;  %v1830_v18 = vsub.f32 %v274_v15, %v282_v16  ;;  %v276_v21 = vld [vmem:[%s1793_s26 + $0x30] sm:$0xff]  ;;  %v1840_v23 = vsub.f32 %v275_v19, %v283_v20  ;;  %v277_v25 = vld [vmem:[%s1793_s26 + $0x38] sm:$0xff]  ;;  %v645_v60 = vld [vmem:[%s2100_s4 + $0x20] sm:$0xff]  ;;  %s259_s26 = scalar_lea.vmem [#allocation2], %s1290_s16 }
  0x1c   : > { %1438 = vmatmul.mubr.msk.f32.vlgmr.msra.gmra.mxu0 %vm310_vm0, %v1808_v11  ;;  %1454 = vmatmul.mubr.msk.f32.vlgmr.msra.gmra.mxu1 %vm310_vm0, %v1808_v11  ;;  %v284_v22 = vld [vmem:[%s1798_s9 + $0x30] sm:$0xff]  ;;  %v285_v26 = vld [vmem:[%s1798_s9 + $0x38] sm:$0xff]  ;;  %v653_v61 = vld [vmem:[%s2101_s5 + $0x20] sm:$0xff]  ;;  %v294_v4 = vmul.f32 %v1803_v7, %v1803_v7  ;;  %v296_v5 = vmul.f32 %v1810_v12, %v1810_v12  ;;  %v295_v6 = vmul.f32 %v1808_v11, %v1808_v11  ;;  %s1215_s28 = sshll.u32 %s259_s26, 4  ;;  %s1216_s28 = int_to_ptr.vmem [resolvable:$true] %s1215_s28 }
  0x1d   : > { %1440 = vmatprep.mubr.msk.f32.mxu0 %vm310_vm0, %v1810_v12  ;;  %1456 = vmatprep.mubr.msk.f32.mxu1 %vm310_vm0, %v1810_v12  ;;  %v1846_v24 = vsub.f32 %v276_v21, %v284_v22  ;;  %v1854_v27 = vsub.f32 %v277_v25, %v285_v26  ;;  %v646_v62 = vld [vmem:[%s2100_s4 + $0x28] sm:$0xff]  ;;  %v647_v0 = vld [vmem:[%s2100_s4 + $0x30] sm:$0xff]  ;;  %v648_v2 = vld [vmem:[%s2100_s4 + $0x38] sm:$0xff]  ;;  %v297_v8 = vmul.f32 %v1824_v17, %v1824_v17 }
  0x1e   : > { %v654_v63 = vld [vmem:[%s2101_s5 + $0x28] sm:$0xff]  ;;  %v655_v1 = vld [vmem:[%s2101_s5 + $0x30] sm:$0xff]  ;;  %v656_v3 = vld [vmem:[%s2101_s5 + $0x38] sm:$0xff]  ;;  %v335_v9 = vsel %vm310_vm0, %v294_v4, 0.0  ;;  %v338_v10 = vsel %vm310_vm0, %v296_v5, 0.0  ;;  %v298_v13 = vmul.f32 %v1830_v18, %v1830_v18  ;;  %v336_v14 = vsel %vm310_vm0, %v295_v6, 0.0 }
  0x1f   : > { %v340_v15 = vsel %vm310_vm0, %v297_v8, 0.0  ;;  %v299_v16 = vmul.f32 %v1840_v23, %v1840_v23  ;;  %v359_v19 = vadd.f32 %v338_v10, %v335_v9  ;;  %v300_v22 = vmul.f32 %v1846_v24, %v1846_v24 }
  0x20   : > { %1441 = vmatmul.mubr.msk.f32.gmra.mxu0 %vm310_vm0, %v1824_v17  ;;  %1457 = vmatmul.mubr.msk.f32.gmra.mxu1 %vm310_vm0, %v1824_v17  ;;  %v362_v20 = vadd.f32 %v340_v15, %v336_v14  ;;  %v342_v21 = vsel %vm310_vm0, %v298_v13, 0.0  ;;  %v301_v26 = vmul.f32 %v1854_v27, %v1854_v27 }
  0x21   : > { %1443 = vmatprep.mubr.msk.f32.mxu0 %vm310_vm0, %v1830_v18  ;;  %1459 = vmatprep.mubr.msk.f32.mxu1 %vm310_vm0, %v1830_v18  ;;  %v344_v25 = vsel %vm310_vm0, %v299_v16, 0.0 }
  0x24   : > { %1444 = vmatmul.mubr.msk.f32.gmra.mxu0 %vm310_vm0, %v1840_v23  ;;  %1460 = vmatmul.mubr.msk.f32.gmra.mxu1 %vm310_vm0, %v1840_v23 }
  0x25   : > { %1446 = vmatprep.mubr.msk.f32.mxu0 %vm310_vm0, %v1846_v24  ;;  %1462 = vmatprep.mubr.msk.f32.mxu1 %vm310_vm0, %v1846_v24 }
  0x28   : > { %1447 = vmatmul.mubr.msk.f32.gmra.mxu0 %vm310_vm0, %v1854_v27  ;;  %1463 = vmatmul.mubr.msk.f32.gmra.mxu1 %vm310_vm0, %v1854_v27 }
  0x29   : > { %1509 = vmatprep.mubr.msk.f32.mxu1 %vm657_vm1, %v1867_v28  ;;  %1481 = vmatprep.mubr.msk.f32.mxu0 %vm657_vm1, %v1874_v29 }
  0xdc   : > { %v1878_v30 = vpop.f32.mrf.mxu0  ;;  %v1455_v31 = vpop.f32.mrf.mxu1 }
  0xdd   : > { %v1904_v52 = vsub.f32 0.0, %v1455_v31  ;;  %v348_v31 = vsel %vm310_vm0, %v301_v26, 0.0 }
  0xde   : > { %v1880_v32 = vpop.f32.mrf.mxu0  ;;  %v594_v33 = vpop.f32.mrf.mxu1 }
  0xdf   : > { %v1910_v53 = vsub.f32 0.0, %v594_v33 }
  0xe0   : > { %v1882_v34 = vpop.f32.mrf.mxu0  ;;  %v1458_v35 = vpop.f32.mrf.mxu1 }
  0xe1   : > { %v1894_v50 = vsub.f32 0.0, %v1458_v35 }
  0xe2   : > { %v1884_v36 = vpop.f32.mrf.mxu0  ;;  %v604_v37 = vpop.f32.mrf.mxu1 }
  0xe3   : > { %v1898_v51 = vsub.f32 0.0, %v604_v37 }
  0xe4   : > { %v1886_v38 = vpop.f32.mrf.mxu0  ;;  %v1461_v39 = vpop.f32.mrf.mxu1 }
  0xe5   : > { %v638_v48 = vsub.f32 0.0, %v1461_v39  ;;  %v303_v39 = vand.u32 2147483647, %v1808_v11  ;;  %v307_v11 = vand.u32 2147483647, %v1840_v23 }
  0xe6   : > { %v1888_v40 = vpop.f32.mrf.mxu0  ;;  %v614_v41 = vpop.f32.mrf.mxu1 }
  0xe7   : > { %v637_v49 = vsub.f32 0.0, %v614_v41 }
  0xe8   : > { %v1448_v42 = vpop.f32.mrf.mxu0  ;;  %v1464_v43 = vpop.f32.mrf.mxu1 }
  0xe9   : > { %v640_v44 = vsub.f32 0.0, %v1464_v43  ;;  %1493 = vmatprep.subr.mxu1 %v1448_v42 }
  0xea   : > { %v519_v45 = vpop.f32.mrf.mxu0  ;;  %v624_v46 = vpop.f32.mrf.mxu1  ;;  %1494 = vmatpush3.msra.mxu1 %v1448_v42 }
  0xeb   : > { %v639_v47 = vsub.f32 0.0, %v624_v46  ;;  %1465 = vmatprep.subr.mxu0 %v640_v44  ;;  %1495 = vmatprep.subr.mxu1 %v519_v45 }
  0xec   : > { %1466 = vmatpush3.msra.mxu0 %v640_v44  ;;  %1496 = vmatpush3.msra.mxu1 %v519_v45 }
  0xed   : > { %1467 = vmatprep.subr.mxu0 %v639_v47  ;;  %1497 = vmatprep.subr.mxu1 %v1886_v38 }
  0xee   : > { %1468 = vmatpush3.msra.mxu0 %v639_v47  ;;  %1498 = vmatpush3.msra.mxu1 %v1886_v38 }
  0xef   : > { %1469 = vmatprep.subr.mxu0 %v638_v48  ;;  %1499 = vmatprep.subr.mxu1 %v1888_v40 }
  0xf0   : > { %1470 = vmatpush3.msra.mxu0 %v638_v48  ;;  %1500 = vmatpush3.msra.mxu1 %v1888_v40 }
  0xf1   : > { %1471 = vmatprep.subr.mxu0 %v637_v49  ;;  %1501 = vmatprep.subr.mxu1 %v1882_v34 }
  0xf2   : > { %1472 = vmatpush3.msra.mxu0 %v637_v49  ;;  %1502 = vmatpush3.msra.mxu1 %v1882_v34 }
  0xf3   : > { %1473 = vmatprep.subr.mxu0 %v1894_v50  ;;  %1503 = vmatprep.subr.mxu1 %v1884_v36 }
  0xf4   : > { %1474 = vmatpush3.msra.mxu0 %v1894_v50  ;;  %1504 = vmatpush3.msra.mxu1 %v1884_v36 }
  0xf5   : > { %1475 = vmatprep.subr.mxu0 %v1898_v51  ;;  %1505 = vmatprep.subr.mxu1 %v1878_v30 }
  0xf6   : > { %1476 = vmatpush3.msra.mxu0 %v1898_v51  ;;  %1506 = vmatpush3.msra.mxu1 %v1878_v30 }
  0xf7   : > { %1477 = vmatprep.subr.mxu0 %v1904_v52  ;;  %1507 = vmatprep.subr.mxu1 %v1880_v32 }
  0xf8   : > { %1478 = vmatpush3.msra.mxu0 %v1904_v52  ;;  %1508 = vmatpush3.msra.mxu1 %v1880_v32 }
  0xf9   : > { %1479 = vmatprep.subr.mxu0 %v1910_v53  ;;  %1549 = vmatprep.subr.mxu1 %v1448_v42 }
  0xfa   : > { %1480 = vmatpush3.msra.mxu0 %v1910_v53  ;;  %1510 = vmatmul.mubr.msk.f32.vlgmr.msra.gmra.mxu1 %vm657_vm1, %v1917_v54 }
  0xfb   : > { %1550 = vmatpush3.msra.mxu1 %v1448_v42  ;;  %1482 = vmatmul.mubr.msk.f32.vlgmr.msra.gmra.mxu0 %vm657_vm1, %v1924_v55  ;;  %v312_v42 = vsel %vm310_vm0, %v303_v39, 0.0 }
  0xfc   : > { %1521 = vmatprep.subr.mxu0 %v640_v44  ;;  %1551 = vmatprep.subr.mxu1 %v519_v45 }
  0xfd   : > { %1522 = vmatpush3.msra.mxu0 %v640_v44  ;;  %1552 = vmatpush3.msra.mxu1 %v519_v45  ;;  %v305_v44 = vand.u32 2147483647, %v1824_v17  ;;  %v320_v17 = vsel %vm310_vm0, %v307_v11, 0.0 }
  0xfe   : > { %1512 = vmatprep.mubr.msk.f32.mxu1 %vm657_vm1, %v643_v56  ;;  %1523 = vmatprep.subr.mxu0 %v639_v47 }
  0xff   : > { %1553 = vmatprep.subr.mxu1 %v1886_v38  ;;  %1484 = vmatprep.mubr.msk.f32.mxu0 %vm657_vm1, %v651_v57 }
 0x100   : > { %1513 = vmatmul.mubr.msk.f32.gmra.mxu1 %vm657_vm1, %v644_v58  ;;  %1524 = vmatpush3.msra.mxu0 %v639_v47  ;;  %v306_v47 = vand.u32 2147483647, %v1830_v18 }
 0x101   : > { %1554 = vmatpush3.msra.mxu1 %v1886_v38  ;;  %1485 = vmatmul.mubr.msk.f32.gmra.mxu0 %vm657_vm1, %v652_v59  ;;  %v302_v38 = vand.u32 2147483647, %v1803_v7  ;;  %v337_v7 = vadd.f32 %v336_v14, %v335_v9 }
 0x102   : > { %1525 = vmatprep.subr.mxu0 %v638_v48  ;;  %1555 = vmatprep.subr.mxu1 %v1888_v40 }
 0x103   : > { %1526 = vmatpush3.msra.mxu0 %v638_v48  ;;  %1556 = vmatpush3.msra.mxu1 %v1888_v40  ;;  %v304_v40 = vand.u32 2147483647, %v1810_v12  ;;  %v311_v41 = vsel %vm310_vm0, %v302_v38, 0.0  ;;  %v316_v48 = vsel %vm310_vm0, %v305_v44, 0.0  ;;  %v318_v12 = vsel %vm310_vm0, %v306_v47, 0.0 }
 0x104   : > { %1515 = vmatprep.mubr.msk.f32.mxu1 %vm657_vm1, %v645_v60  ;;  %1527 = vmatprep.subr.mxu0 %v637_v49  ;;  %v313_v43 = vadd.f32 %v312_v42, %v311_v41 }
 0x105   : > { %1557 = vmatprep.subr.mxu1 %v1882_v34  ;;  %1487 = vmatprep.mubr.msk.f32.mxu0 %vm657_vm1, %v653_v61  ;;  %v314_v45 = vsel %vm310_vm0, %v304_v40, 0.0 }
 0x106   : > { %1516 = vmatmul.mubr.msk.f32.gmra.mxu1 %vm657_vm1, %v646_v62  ;;  %1528 = vmatpush3.msra.mxu0 %v637_v49  ;;  %v315_v46 = vadd.f32 %v314_v45, %v313_v43 }
 0x107   : > { %1558 = vmatpush3.msra.mxu1 %v1882_v34  ;;  %1488 = vmatmul.mubr.msk.f32.gmra.mxu0 %vm657_vm1, %v654_v63 }
 0x108   : > { %1529 = vmatprep.subr.mxu0 %v1894_v50  ;;  %1559 = vmatprep.subr.mxu1 %v1884_v36  ;;  %v317_v49 = vadd.f32 %v316_v48, %v315_v46 }
 0x109   : > { %1530 = vmatpush3.msra.mxu0 %v1894_v50  ;;  %1560 = vmatpush3.msra.mxu1 %v1884_v36 }
 0x10a   : > { %1518 = vmatprep.mubr.msk.f32.mxu1 %vm657_vm1, %v647_v0  ;;  %1531 = vmatprep.subr.mxu0 %v1898_v51 }
 0x10b   : > { %1561 = vmatprep.subr.mxu1 %v1878_v30  ;;  %1490 = vmatprep.mubr.msk.f32.mxu0 %vm657_vm1, %v655_v1 }
 0x10c   : > { %1519 = vmatmul.mubr.msk.f32.gmra.mxu1 %vm657_vm1, %v648_v2  ;;  %1532 = vmatpush3.msra.mxu0 %v1898_v51  ;;  %v319_v51 = vadd.f32 %v318_v12, %v317_v49 }
 0x10d   : > { %1562 = vmatpush3.msra.mxu1 %v1878_v30  ;;  %1491 = vmatmul.mubr.msk.f32.gmra.mxu0 %vm657_vm1, %v656_v3  ;;  %v346_v30 = vsel %vm310_vm0, %v300_v22, 0.0 }
 0x10e   : > { %1533 = vmatprep.subr.mxu0 %v1904_v52  ;;  %1563 = vmatprep.subr.mxu1 %v1880_v32 }
 0x10f   : > { %1534 = vmatpush3.msra.mxu0 %v1904_v52  ;;  %1564 = vmatpush3.msra.mxu1 %v1880_v32 }
 0x110   : > { %1535 = vmatprep.subr.mxu0 %v1910_v53  ;;  %1565 = vmatprep.mubr.msk.f32.mxu1 %vm657_vm1, %v1874_v29  ;;  %v363_v29 = vadd.f32 %v362_v20, %v344_v25 }
 0x111   : > { %1536 = vmatpush3.msra.mxu0 %v1910_v53  ;;  %1537 = vmatprep.mubr.msk.f32.mxu0 %vm657_vm1, %v1867_v28  ;;  %v360_v28 = vadd.f32 %v359_v19, %v342_v21  ;;  %v308_v53 = vand.u32 2147483647, %v1846_v24 }
 0x112   : > { %1566 = vmatmul.mubr.msk.f32.vlgmr.msra.gmra.mxu1 %vm657_vm1, %v1924_v55  ;;  %1538 = vmatmul.mubr.msk.f32.vlgmr.msra.gmra.mxu0 %vm657_vm1, %v1917_v54  ;;  %v364_v33 = vadd.f32 %v363_v29, %v348_v31  ;;  %v339_v55 = vadd.f32 %v338_v10, %v337_v7 }
 0x113   : > { %1568 = vmatprep.mubr.msk.f32.mxu1 %vm657_vm1, %v651_v57  ;;  %1540 = vmatprep.mubr.msk.f32.mxu0 %vm657_vm1, %v643_v56  ;;  %v361_v32 = vadd.f32 %v360_v28, %v346_v30  ;;  %v321_v56 = vadd.f32 %v320_v17, %v319_v51 }
 0x114   : > { %v366_v35 = vmul.f32 0.25, %v364_v33 }
 0x115   : > { %v365_v34 = vmul.f32 0.25, %v361_v32 }
 0x116   : > { %1569 = vmatmul.mubr.msk.f32.gmra.mxu1 %vm657_vm1, %v652_v59  ;;  %1541 = vmatmul.mubr.msk.f32.gmra.mxu0 %vm657_vm1, %v644_v58  ;;  %v368_v37 = vadd.f32 1e-06, %v366_v35  ;;  %v309_v58 = vand.u32 2147483647, %v1854_v27  ;;  %v322_v59 = vsel %vm310_vm0, %v308_v53, 0.0 }
 0x117   : > { %1571 = vmatprep.mubr.msk.f32.mxu1 %vm657_vm1, %v653_v61  ;;  %1543 = vmatprep.mubr.msk.f32.mxu0 %vm657_vm1, %v645_v60  ;;  %v367_v36 = vadd.f32 1e-06, %v365_v34  ;;  %v323_v60 = vadd.f32 %v322_v59, %v321_v56 }
 0x118   : > { %vm378_vm4 = vcmp.eq.f32.partialorder %v368_v37, inf  ;;  %vm380_vm5 = vcmp.eq.f32.partialorder %v368_v37, 0.0  ;;  %v324_v24 = vsel %vm310_vm0, %v309_v58, 0.0 }
 0x119   : > { %1626 = vrsqrt.f32 %v367_v36  ;;  %vm371_vm2 = vcmp.eq.f32.partialorder %v367_v36, inf  ;;  %v374_v18 = vand.u32 2147483648, %v367_v36  ;;  %vm373_vm3 = vcmp.eq.f32.partialorder %v367_v36, 0.0 }
 0x11a   : > { %1572 = vmatmul.mubr.msk.f32.gmra.mxu1 %vm657_vm1, %v654_v63  ;;  %1544 = vmatmul.mubr.msk.f32.gmra.mxu0 %vm657_vm1, %v646_v62  ;;  %1628 = vrsqrt.f32 %v368_v37  ;;  %v381_v63 = vand.u32 2147483648, %v368_v37 }
 0x11b   : > { %1574 = vmatprep.mubr.msk.f32.mxu1 %vm657_vm1, %v655_v1  ;;  %1546 = vmatprep.mubr.msk.f32.mxu0 %vm657_vm1, %v647_v0  ;;  %v325_v0 = vadd.f32 %v324_v24, %v323_v60 }
 0x11d   : > { %326 = vadd.xlane.f32.xlu0 %v325_v0 }
 0x11e   : > { %1575 = vmatmul.mubr.msk.f32.gmra.mxu1 %vm657_vm1, %v656_v3  ;;  %1547 = vmatmul.mubr.msk.f32.gmra.mxu0 %vm657_vm1, %v648_v2  ;;  %v341_v2 = vadd.f32 %v340_v15, %v339_v55 }
 0x120   : > { %v343_v4 = vadd.f32 %v342_v21, %v341_v2 }
 0x122   : > { %v345_v6 = vadd.f32 %v344_v25, %v343_v4 }
 0x124   : > { %v347_v8 = vadd.f32 %v346_v30, %v345_v6 }
 0x126   : > { %v1627_v50 = vpop.eup %1626  ;;  %v349_v9 = vadd.f32 %v348_v31, %v347_v8 }
 0x127   : > { %v1629_v52 = vpop.eup %1628  ;;  %v370_v54 = vmul.f32 %v1627_v50, %v367_v36 }
 0x128   : > { %v377_v57 = vmul.f32 %v1629_v52, %v368_v37  ;;  %350 = vadd.xlane.f32.xlu0 %v349_v9 }
 0x129   : > { %v372_v23 = vsel %vm371_vm2, %v367_v36, %v370_v54 }
 0x12a   : > { %v375_v61 = vsel %vm373_vm3, %v374_v18, %v372_v23  ;;  %v379_v62 = vsel %vm378_vm4, %v368_v37, %v377_v57 }
 0x12b   : > { %v383_v1 = vsel %vm310_vm0, %v375_v61, 0.0  ;;  %v382_v3 = vsel %vm380_vm5, %v381_v63, %v379_v62 }
 0x12c   : > { %v384_v27 = vsel %vm310_vm0, %v382_v3, 0.0 }
 0x12d   : > { %v385_v5 = vadd.f32 %v384_v27, %v383_v1 }
 0x12f   : > { %386 = vadd.xlane.f32.xlu1 %v385_v5 }
 0x1ba   : > { %v1511_v10 = vpop.f32.mrf.mxu1 }
 0x1bb   : > { %v1483_v13 = vpop.f32.mrf.mxu0 }
 0x1bc   : > { %v877_v14 = vpop.f32.mrf.mxu1  ;;  %v883_v20 = vadd.f32 %v1511_v10, %v1483_v13 }
 0x1bd   : > { %v748_v16 = vpop.f32.mrf.mxu0 }
 0x1be   : > { %v878_v19 = vadd.f32 %v877_v14, %v748_v16  ;;  %v1135_v32 = vand.u32 2147483647, %v883_v20 }
 0x1c0   : > { %v1514_v22 = vpop.f32.mrf.mxu1  ;;  %v1134_v15 = vand.u32 2147483647, %v878_v19 }
 0x1c1   : > { %v1486_v26 = vpop.f32.mrf.mxu0 }
 0x1c2   : > { %v887_v28 = vpop.f32.mrf.mxu1  ;;  %v893_v33 = vadd.f32 %v1514_v22, %v1486_v26  ;;  %v1142_v34 = vadd.f32 %v1135_v32, %v1134_v15 }
 0x1c3   : > { %v758_v29 = vpop.f32.mrf.mxu0 }
 0x1c4   : > { %v888_v21 = vadd.f32 %v887_v28, %v758_v29  ;;  %v1137_v31 = vand.u32 2147483647, %v893_v33  ;;  %v327_v28 = vpop.xlane.xlu0 %326 }
 0x1c5   : > { %v328_v29 = vrot.slane %v327_v28, 4 }
 0x1c6   : > { %v1136_v25 = vand.u32 2147483647, %v888_v21  ;;  %v1517_v35 = vpop.f32.mrf.mxu1  ;;  %v387_v21 = vpop.xlane.xlu1 %386 }
 0x1c7   : > { %v1489_v30 = vpop.f32.mrf.mxu0 }
 0x1c8   : > { %v1143_v36 = vadd.f32 %v1142_v34, %v1136_v25  ;;  %v897_v37 = vpop.f32.mrf.mxu1  ;;  %v903_v39 = vadd.f32 %v1517_v35, %v1489_v30  ;;  %v329_v34 = vadd.f32 %v328_v29, %v327_v28  ;;  %v388_v25 = vrot.slane %v387_v21, 4 }
 0x1c9   : > { %v768_v38 = vpop.f32.mrf.mxu0 }
 0x1ca   : > { %v898_v40 = vadd.f32 %v897_v37, %v768_v38  ;;  %v1144_v41 = vadd.f32 %v1143_v36, %v1137_v31  ;;  %v1139_v45 = vand.u32 2147483647, %v903_v39  ;;  %v330_v31 = vrot.slane %v329_v34, 2  ;;  %v351_v39 = vpop.xlane.xlu0 %350 }
 0x1cb   : > { %v389_v36 = vadd.f32 %v388_v25, %v387_v21 }
 0x1cc   : > { %v1138_v42 = vand.u32 2147483647, %v898_v40  ;;  %v1520_v43 = vpop.f32.mrf.mxu1  ;;  %v331_v40 = vadd.f32 %v330_v31, %v329_v34 }
 0x1cd   : > { %v1492_v44 = vpop.f32.mrf.mxu0  ;;  %v390_v38 = vrot.slane %v389_v36, 2 }
 0x1ce   : > { %v1145_v46 = vadd.f32 %v1144_v41, %v1138_v42  ;;  %v907_v47 = vpop.f32.mrf.mxu1  ;;  %v913_v49 = vadd.f32 %v1520_v43, %v1492_v44  ;;  %v352_v41 = vrot.slane %v351_v39, 4  ;;  %v332_v42 = vrot.slane %v331_v40, 1 }
 0x1cf   : > { %v778_v48 = vpop.f32.mrf.mxu0  ;;  %v391_v43 = vadd.f32 %v390_v38, %v389_v36 }
 0x1d0   : > { %v908_v7 = vadd.f32 %v907_v47, %v778_v48  ;;  %v1146_v11 = vadd.f32 %v1145_v46, %v1139_v45  ;;  %v1141_v52 = vand.u32 2147483647, %v913_v49  ;;  %v353_v44 = vadd.f32 %v352_v41, %v351_v39 }
 0x1d1   : > { %v333_v45 = vadd.f32 %v332_v42, %v331_v40  ;;  %v392_v47 = vrot.slane %v391_v43, 1 }
 0x1d2   : > { %v1140_v12 = vand.u32 2147483647, %v908_v7  ;;  %v1567_v50 = vpop.f32.mrf.mxu1  ;;  %v1539_v51 = vpop.f32.mrf.mxu0  ;;  %v354_v46 = vrot.slane %v353_v44, 2 }
 0x1d3   : > { %v1127_v55 = vsub.f32 %v1539_v51, %v1567_v50  ;;  %1577 = vpush %v333_v45  ;;  %v393_v7 = vadd.f32 %v392_v47, %v391_v43 }
 0x1d4   : > { %v1147_v53 = vadd.f32 %v1146_v11, %v1140_v12  ;;  %v1087_v17 = vpop.f32.mrf.mxu1  ;;  %v982_v54 = vpop.f32.mrf.mxu0  ;;  %v355_v48 = vadd.f32 %v354_v46, %v353_v44 }
 0x1d5   : > { %v1126_v56 = vsub.f32 %v982_v54, %v1087_v17  ;;  %v1159_v61 = vand.u32 2147483647, %v1127_v55 }
 0x1d6   : > { %v1570_v18 = vpop.f32.mrf.mxu1  ;;  %v1542_v57 = vpop.f32.mrf.mxu0  ;;  %v1148_v58 = vadd.f32 %v1147_v53, %v1141_v52  ;;  %v356_v49 = vrot.slane %v355_v48, 1 }
 0x1d7   : > { %v1158_v59 = vand.u32 2147483647, %v1126_v56  ;;  %v1129_v24 = vsub.f32 %v1542_v57, %v1570_v18 }
 0x1d8   : > { %v1097_v23 = vpop.f32.mrf.mxu1  ;;  %v992_v60 = vpop.f32.mrf.mxu0  ;;  %1149 = vadd.xlane.f32.xlu1 %v1148_v58  ;;  %v357_v11 = vadd.f32 %v356_v49, %v355_v48 }
 0x1d9   : > { %v1128_v62 = vsub.f32 %v992_v60, %v1097_v23  ;;  %v1166_v1 = vadd.f32 %v1159_v61, %v1158_v59  ;;  %v1161_v4 = vand.u32 2147483647, %v1129_v24  ;;  %v1183_v60 = vlaneseq }
 0x1da   : > { %v1573_v63 = vpop.f32.mrf.mxu1  ;;  %v1545_v0 = vpop.f32.mrf.mxu0  ;;  %1579 = vpush %v357_v11 }
 0x1db   : > { %v1160_v2 = vand.u32 2147483647, %v1128_v62  ;;  %v1131_v6 = vsub.f32 %v1545_v0, %v1573_v63  ;;  %1581 = vpush %v393_v7  ;;  %v1184_v61 = vshrl.u32 %v1183_v60, 7 }
 0x1dc   : > { %v1107_v3 = vpop.f32.mrf.mxu1  ;;  %v1002_v27 = vpop.f32.mrf.mxu0 }
 0x1dd   : > { %v1167_v5 = vadd.f32 %v1166_v1, %v1160_v2  ;;  %v1130_v8 = vsub.f32 %v1002_v27, %v1107_v3  ;;  %v1163_v20 = vand.u32 2147483647, %v1131_v6  ;;  %vm1185_vm6 = vcmp.eq.s32.totalorder %v1184_v61, 0 }
 0x1de   : > { %v1576_v9 = vpop.f32.mrf.mxu1  ;;  %v1548_v10 = vpop.f32.mrf.mxu0  ;;  %vm1188_vm7 = vcmp.eq.s32.totalorder %v1184_v61, 1  ;;  %vm1192_vm8 = vcmp.eq.s32.totalorder %v1184_v61, 2  ;;  %vm1196_vm9 = vcmp.eq.s32.totalorder %v1184_v61, 3 }
 0x1df   : > { %v1162_v13 = vand.u32 2147483647, %v1130_v8  ;;  %v1168_v14 = vadd.f32 %v1167_v5, %v1161_v4  ;;  %v1133_v26 = vsub.f32 %v1548_v10, %v1576_v9 }
 0x1e0   : > { %v1117_v16 = vpop.f32.mrf.mxu1  ;;  %v1012_v19 = vpop.f32.mrf.mxu0 }
 0x1e1   : > { %v1169_v22 = vadd.f32 %v1168_v14, %v1162_v13  ;;  %v1132_v15 = vsub.f32 %v1012_v19, %v1117_v16  ;;  %v1165_v35 = vand.u32 2147483647, %v1133_v26 }
 0x1e3   : > { %v1164_v32 = vand.u32 2147483647, %v1132_v15  ;;  %v1170_v33 = vadd.f32 %v1169_v22, %v1163_v20 }
 0x1e5   : > { %v1171_v30 = vadd.f32 %v1170_v33, %v1164_v32 }
 0x1e7   : > { %v1172_v37 = vadd.f32 %v1171_v30, %v1165_v35 }
 0x1e9   : > { %1173 = vadd.xlane.f32.xlu0 %v1172_v37 }
 0x204   : > { %s1578_s12 = spop %1577 }
 0x205   : > { %v1186_v24 = vstv %s1578_s12  ;;  %s1630_s12 = scalar_lea.vmem %s1216_s28, 128 }
 0x206   : > { %v1187_v63 = vsel %vm1185_vm6, %v1186_v24, 0.0  ;;  %p1631_p11 = scmp.ne.s32.totalorder %s1216_s28, %s1630_s12 }
 0x208   : > { %p1632_p12 = pnand %p1631_p11, %p1766_p5 }
 0x20a   : > { %p1633_p13 = pneg %p1632_p12 }
 0x20b   : > { %s1580_s13 = spop %1579 }
 0x20c   : > { %v1189_v62 = vstv %s1580_s13  ;;  %s1582_s15 = spop %1581  ;;  %s1692_s13 = smov [#allocation2]  }
 0x20d   : > { %v1190_v0 = vsel %vm1188_vm7, %v1189_v62, 0.0  ;;  %v1193_v1 = vstv %s1582_s15  ;;  %s1634_s25 = sshll.u32 %s1692_s13, 4  ;;  %s1635_s25 = int_to_ptr.vmem [resolvable:$false] %s1634_s25 }
 0x20e   : > { %v1191_v2 = vadd.f32 %v1190_v0, %v1187_v63  ;;  %v1194_v3 = vsel %vm1192_vm8, %v1193_v1, 0.0  ;;  %s1636_s15 = scalar_lea.vmem %s1635_s25, 256  ;;  %p1637_p0 = scmp.lt.s32.totalorder %s1216_s28, %s1635_s25 }
 0x20f   : > { %p1638_p1 = scmp.lt.s32.totalorder %s1636_s15, %s1630_s12 }
 0x210   : > { %v1195_v27 = vadd.f32 %v1194_v3, %v1191_v2 }
 0x211   : > { %p1639_p2 = por %p1638_p1, %p1637_p0 }
 0x213   : > { %p1640_p3 = pnand %p1639_p2, %p1633_p13 }
 0x261   : > { %v1150_v12 = vpop.xlane.xlu1 %1149 }
 0x262   : > { %v1151_v50 = vrot.slane %v1150_v12, 4 }
 0x264   : > { %v1152_v51 = vadd.f32 %v1151_v50, %v1150_v12 }
 0x266   : > { %v1153_v52 = vrot.slane %v1152_v51, 2 }
 0x268   : > { %v1154_v53 = vadd.f32 %v1153_v52, %v1152_v51 }
 0x26a   : > { %v1155_v17 = vrot.slane %v1154_v53, 1 }
 0x26c   : > { %v1156_v54 = vadd.f32 %v1155_v17, %v1154_v53 }
 0x26e   : > { %1583 = vpush %v1156_v54 }
 0x272   : > { %v1174_v55 = vpop.xlane.xlu0 %1173 }
 0x273   : > { %v1175_v56 = vrot.slane %v1174_v55, 4 }
 0x275   : > { %v1176_v18 = vadd.f32 %v1175_v56, %v1174_v55 }
 0x277   : > { %v1177_v57 = vrot.slane %v1176_v18, 2 }
 0x279   : > { %v1178_v58 = vadd.f32 %v1177_v57, %v1176_v18 }
 0x27b   : > { %v1179_v59 = vrot.slane %v1178_v58, 1 }
 0x27d   : > { %v1180_v23 = vadd.f32 %v1179_v59, %v1178_v58 }
 0x27f   : > { %1585 = vpush %v1180_v23 }
 0x29f   : > { %s1584_s17 = spop %1583 }
 0x2b0   : > { %s1586_s18 = spop %1585 }
 0x2b1   : > { %s1182_s19 = sadd.f32 %s1586_s18, %s1584_s17 }
 0x2b3   : > { %v1197_v4 = vstv %s1182_s19 }
 0x2b4   : > { %v1198_v5 = vsel %vm1196_vm9, %v1197_v4, 0.0 }
 0x2b5   : > { %v1199_v6 = vadd.f32 %v1198_v5, %v1195_v27 }
 0x2b7   : > { %1200 = vst [vmem:[%s259_s26] sm:$0xff] %v1199_v6 }
 0x2b8   : > { %1643 = shalt.err (!%p1640_p3)
}
 0x2b9   : > { %s1644_s16 = scalar_lea.hbm %s1213_s10, 128  ;;  %s1648_s18 = scalar_lea.hbm %s2102_s6, 256 }
 0x2ba   : > { %p1645_p4 = scmp.ne.s32.totalorder %s1213_s10, %s1644_s16  ;;  %p1649_p9 = scmp.lt.s32.totalorder %s1213_s10, %s2102_s6 }
 0x2bb   : > { %p1650_p10 = scmp.lt.s32.totalorder %s1648_s18, %s1644_s16 }
 0x2bc   : > { %p1646_p7 = pnand %p1645_p4, %p1766_p5 }
 0x2bd   : > { %p1651_p11 = por %p1650_p10, %p1649_p9 }
 0x2be   : > { %p1647_p8 = pneg %p1646_p7 }
 0x2c0   : > { %p1652_p12 = pnand %p1651_p11, %p1647_p8 }
 0x2c2   : > { %1655 = shalt.err (!%p1652_p12)
}
 0x2c3   : > { %1587 = dma.vmem_to_hbm [thread:$0]  (%p1766_p5), %s1216_s28, 128, %s1213_s10, %s1202_s11  }
 0x2c4 PF: > { %p1593_p13 = scmp.ge.s32.totalorder %s1690_s24, 2  ;;  %s1227_s26 = sand.u32 1, %s1678_s21  }
 0x2c5   : > { %s1228_s29 = scalar_lea.sflag [#allocation3], %s1227_s26 }
 0x2c6   : > { %p1590_p0 = pnand %p1593_p13, %p1770_p6 }
 0x2c8   : > { %p1591_p1 = pneg %p1590_p0 }
 0x2ca   : > { %1673 = dma.done.wait (%p1591_p1), %s1228_s29, 128  }
 0x2cb   : > { %1675 = vsyncadd (%p1591_p1), %s1228_s29, 4294967168  ;;  %p16_p2 = scmp.ge.s32.totalorder %s1753_s27, 4   ;;  %s2105_s21 = smov %s1682_s22 }
 0x2cc   : > { %s2106_s22 = smov %s1686_s23  ;;  %s2107_s23 = smov %s1764_s30 }
 0x2cd   : > { %s2108_s24 = smov %s1753_s27  ;;  %18 = sbr.rel (!%p16_p2) target bundleno = 3 (0x3), region = 82 }
 0x2d2   :  { %1233 = vsyncpa [#allocation3], 1 }
 0x2d3   :  { %1235 = vsyncpa [#allocation3 + $0x1], 1 }

</bundles_post_ra>
